<compile_context>
chip_gen: v6e
topology: v6e:2x2x1
jax: 0.10.0
libtpu: 0.0.40
codegen_flags: <defaults>
</compile_context>

<pallas_src>
import jax
import jax.numpy as jnp
import numpy as np
from jax import lax
from jax.experimental import pallas as pl
from jax.experimental.pallas import tpu as pltpu

_CIN, _HIN, _WIN = 3, 8, 8
_FIN = _CIN * _HIN * _WIN          # 192 flattened input features per sample (ci, h, w)
_C1 = 6                            # conv1 output channels
_POOL_POS = 9                      # 3x3 pooled positions
_P54 = _POOL_POS * _C1             # 54 real pooled features
_GRP = 64                          # padded width of one pool-quadrant column group
_H1W = 4 * _GRP                    # 256 conv1-matmul output columns (4 quadrants x 64)
_C2 = 18                           # conv2 output channels == fc input features
_OUT = 4                           # fc output features
_TB_MAX = 2048                     # max batch rows per grid step (1.5 MiB f32 input block)


def _conv1_expansion_indices():
    """Static (numpy) gather indices + mask that turn the conv1 OIHW weight into a
    (192, 256) matmul weight.

    Column c = quad*64 + (pool_i*3 + pool_j)*6 + co, where quad -> (dh, dw) is the position
    inside the 2x2 maxpool window (columns 54..63 of each group are zero padding).
    Row f = ci*64 + h*8 + w, i.e. the per-sample NCHW flatten order of the input.
    """
    cols = np.arange(_H1W)
    quad = cols // _GRP
    loc = cols % _GRP
    col_valid = loc < _P54
    loc_c = np.minimum(loc, _P54 - 1)
    pos = loc_c // _C1
    co = loc_c % _C1
    oh = 2 * (pos // 3) + quad // 2            # conv1 output row = 2*pool_i + dh
    ow = 2 * (pos % 3) + quad % 2              # conv1 output col = 2*pool_j + dw

    rows = np.arange(_FIN)
    ci = rows // (_HIN * _WIN)
    h = (rows % (_HIN * _WIN)) // _WIN
    w = rows % _WIN

    kh = h[:, None] - oh[None, :]
    kw = w[:, None] - ow[None, :]
    valid = (kh >= 0) & (kh < 3) & (kw >= 0) & (kw < 3) & col_valid[None, :]
    return (valid,
            np.broadcast_to(co[None, :], (_FIN, _H1W)),
            np.broadcast_to(ci[:, None], (_FIN, _H1W)),
            np.clip(kh, 0, 2),
            np.clip(kw, 0, 2))


_C1_VALID, _C1_CO, _C1_CI, _C1_KH, _C1_KW = _conv1_expansion_indices()


def _convnet2d_kernel(x_ref, w1_ref, b1_ref, w2_ref, b2_ref, wf_ref, bf_ref, o_ref):
    """One batch tile (TB rows) per grid step.

    All contractions run on the MXU; the VPU only does bias + ReLU + max.  The 2x2/2 maxpool
    is two element-wise maxima over lane slices of the 256-wide conv1 output, because the
    four 64-wide column groups are exactly the four pool-window quadrants.
    """
    x = x_ref[...]                                                        # (TB, 192) f32
    h1 = jnp.dot(x, w1_ref[...], preferred_element_type=jnp.float32)     # (TB, 256)  MXU
    h1 = jnp.maximum(h1 + b1_ref[...], 0.0)                               # bias + ReLU

    # maxpool 2x2 stride 2: combine the four quadrant groups (lane-aligned slices).
    m = jnp.maximum(h1[:, : 2 * _GRP], h1[:, 2 * _GRP:])                  # (TB, 128)
    p = jnp.maximum(m[:, :_GRP], m[:, _GRP:])                             # (TB, 64): 54 + pad

    h2 = jnp.dot(p, w2_ref[...], preferred_element_type=jnp.float32)     # (TB, 18)   MXU
    h2 = jnp.maximum(h2 + b2_ref[...], 0.0)                               # bias + ReLU

    o = jnp.dot(h2, wf_ref[...], preferred_element_type=jnp.float32)     # (TB, 4)    MXU
    o_ref[...] = o + bf_ref[...]


def _block_rows(n):
    """Batch rows per grid step: big enough to amortize the per-step overhead, but at least
    two grid steps when the batch allows (so v7x's two TensorCores both get work)."""
    tb = min(_TB_MAX, max(8, -(-n // 2)))
    return -(-tb // 8) * 8                      # sublane multiple


@jax.jit
def convnet2d_forward(x_nchw, params):
    """params use PyTorch layouts: conv weights OIHW, conv biases (C,), fc (out,in), (out,)."""
    w1, b1, w2, b2, wf, bf = params
    n, c, h, w = x_nchw.shape
    assert (c, h, w) == (_CIN, _HIN, _WIN), "TestConvNet2d's fc(18, 4) implies a 3x8x8 input"

    tb = _block_rows(n)
    g = pl.cdiv(n, tb)
    n_pad = g * tb

    # ---- activations: plain per-sample flatten, no HBM transpose ----
    x2d = x_nchw.astype(jnp.float32).reshape(n, _FIN)
    if n_pad != n:
        x2d = jnp.pad(x2d, ((0, n_pad - n), (0, 0)))

    # ---- expanded / repacked weights (tiny, built once per call) ----
    f32 = jnp.float32
    w1e = jnp.where(_C1_VALID,
                    w1.astype(f32)[_C1_CO, _C1_CI, _C1_KH, _C1_KW],
                    0.0)                                                   # (192, 256)
    b1g = jnp.concatenate([jnp.tile(b1.astype(f32), _POOL_POS),
                           jnp.zeros((_GRP - _P54,), f32)])
    b1e = jnp.tile(b1g, 4).reshape(1, _H1W)                                # (1, 256)
    w2e = jnp.concatenate(
        [jnp.transpose(w2.astype(f32), (2, 3, 1, 0)).reshape(_P54, _C2),   # (kh,kw,ci,co2)
         jnp.zeros((_GRP - _P54, _C2), f32)], axis=0)                      # (64, 18)
    b2e = b2.astype(f32).reshape(1, _C2)
    wfe = wf.astype(f32).T                                                 # (18, 4)
    bfe = bf.astype(f32).reshape(1, _OUT)

    out = pl.pallas_call(
        _convnet2d_kernel,
        out_shape=jax.ShapeDtypeStruct((n_pad, _OUT), jnp.float32),
        grid=(g,),
        in_specs=[
            pl.BlockSpec((tb, _FIN), lambda b: (b, 0)),     # one batch tile of activations
            pl.BlockSpec((_FIN, _H1W), lambda b: (0, 0)),   # expanded conv1 weight
            pl.BlockSpec((1, _H1W), lambda b: (0, 0)),      # expanded conv1 bias
            pl.BlockSpec((_GRP, _C2), lambda b: (0, 0)),    # expanded conv2 weight
            pl.BlockSpec((1, _C2), lambda b: (0, 0)),       # conv2 bias
            pl.BlockSpec((_C2, _OUT), lambda b: (0, 0)),    # fc weight (in, out)
            pl.BlockSpec((1, _OUT), lambda b: (0, 0)),      # fc bias
        ],
        out_specs=pl.BlockSpec((tb, _OUT), lambda b: (b, 0)),
        compiler_params=pltpu.CompilerParams(
            dimension_semantics=("parallel",),
            vmem_limit_bytes=32 * 1024 * 1024),
    )(x2d, w1e, b1e, w2e, b2e, wfe, bfe)

    return out[:n]


def reference_forward(x, params):
    """Pure-JAX reference matching the PyTorch module exactly (NCHW throughout)."""
    w1, b1, w2, b2, wf, bf = params
    dn = ("NCHW", "OIHW", "NCHW")
    y = lax.conv_general_dilated(x, w1, (1, 1), "VALID", dimension_numbers=dn,
                                 precision=lax.Precision.HIGHEST)
    y = jax.nn.relu(y + b1[None, :, None, None])
    y = lax.reduce_window(y, -jnp.inf, lax.max, (1, 1, 2, 2), (1, 1, 2, 2), "VALID")
    y = lax.conv_general_dilated(y, w2, (1, 1), "VALID", dimension_numbers=dn,
                                 precision=lax.Precision.HIGHEST)
    y = jax.nn.relu(y + b2[None, :, None, None])
    y = y.reshape(y.shape[0], -1)                                          # (N, 18)
    return jnp.dot(y, wf.T, precision=lax.Precision.HIGHEST) + bf


if __name__ == "__main__":
    key = jax.random.PRNGKey(0)
    kx, k1, k2, k3, k4, k5, k6 = jax.random.split(key, 7)

    # Input spatial size must be 8x8 so the 18 post-conv2 features match fc(18, 4).
    x = jax.random.normal(kx, (2, 3, 8, 8), jnp.float32)                   # NCHW, like PyTorch

    params = (
        0.1 * jax.random.normal(k1, (6, 3, 3, 3), jnp.float32),            # conv1.weight (OIHW)
        0.1 * jax.random.normal(k2, (6,), jnp.float32),                    # conv1.bias
        0.1 * jax.random.normal(k3, (18, 6, 3, 3), jnp.float32),           # conv2.weight (OIHW)
        0.1 * jax.random.normal(k4, (18,), jnp.float32),                   # conv2.bias
        0.1 * jax.random.normal(k5, (4, 18), jnp.float32),                 # fc.weight (out, in)
        0.1 * jax.random.normal(k6, (4,), jnp.float32),                    # fc.bias
    )

    out = jax.block_until_ready(convnet2d_forward(x, params))
    assert out.shape == (2, 4), out.shape
    ref = reference_forward(x, params)
    if not jnp.allclose(out, ref, atol=1e-4, rtol=1e-4):
        raise AssertionError(f"mismatch: max|diff|={float(jnp.max(jnp.abs(out - ref)))}")

    # Secondary check: multi-step grid + batch-padding path (g >= 2, remainder rows).
    xb = jax.random.normal(jax.random.PRNGKey(1), (100, 3, 8, 8), jnp.float32)
    outb = jax.block_until_ready(convnet2d_forward(xb, params))
    refb = reference_forward(xb, params)
    if not jnp.allclose(outb, refb, atol=1e-4, rtol=1e-4):
        raise AssertionError(f"mismatch(batch): max|diff|={float(jnp.max(jnp.abs(outb - refb)))}")

    print("KERNEL_OK")
</pallas_src>

<mosaic_0001>
module attributes {stable_mosaic.version = 11 : i64} {
  func.func @_convnet2d_kernel(%arg0: i32, %arg1: memref<8x192xf32, #tpu.memory_space<vmem>>, %arg2: memref<192x256xf32, #tpu.memory_space<vmem>>, %arg3: memref<1x256xf32, #tpu.memory_space<vmem>>, %arg4: memref<64x18xf32, #tpu.memory_space<vmem>>, %arg5: memref<1x18xf32, #tpu.memory_space<vmem>>, %arg6: memref<18x4xf32, #tpu.memory_space<vmem>>, %arg7: memref<1x4xf32, #tpu.memory_space<vmem>>, %arg8: memref<8x4xf32, #tpu.memory_space<vmem>>) attributes {dimension_semantics = [#tpu.dimension_semantics<parallel>], iteration_bounds = array<i64: 1>, scalar_prefetch = 0 : i64, scratch_operands = 0 : i64, tpu.core_type = #tpu.core_type<tc>, window_params = [{transform_indices = @transform_0, window_bounds = array<i64: 8, 192>}, {pipeline_mode = #tpu.pipeline_mode<synchronous>, transform_indices = @transform_1, window_bounds = array<i64: 192, 256>}, {pipeline_mode = #tpu.pipeline_mode<synchronous>, transform_indices = @transform_2, window_bounds = array<i64: 1, 256>}, {pipeline_mode = #tpu.pipeline_mode<synchronous>, transform_indices = @transform_3, window_bounds = array<i64: 64, 18>}, {pipeline_mode = #tpu.pipeline_mode<synchronous>, transform_indices = @transform_4, window_bounds = array<i64: 1, 18>}, {pipeline_mode = #tpu.pipeline_mode<synchronous>, transform_indices = @transform_5, window_bounds = array<i64: 18, 4>}, {pipeline_mode = #tpu.pipeline_mode<synchronous>, transform_indices = @transform_6, window_bounds = array<i64: 1, 4>}, {transform_indices = @transform_7, window_bounds = array<i64: 8, 4>}]} {
    %c0 = arith.constant 0 : index
    %c0_0 = arith.constant 0 : index
    %0 = vector.load %arg1[%c0, %c0_0] : memref<8x192xf32, #tpu.memory_space<vmem>>, vector<8x192xf32>
    %c0_1 = arith.constant 0 : index
    %c0_2 = arith.constant 0 : index
    %1 = vector.load %arg2[%c0_1, %c0_2] : memref<192x256xf32, #tpu.memory_space<vmem>>, vector<192x256xf32>
    %cst = arith.constant dense<0.000000e+00> : vector<8x256xf32>
    %2 = tpu.matmul %0, %1, %cst {dimension_numbers = #tpu.dot_dimension_numbers<[1], [0], [0], [1], [0, 0, 1, 1], [], []>} : vector<8x192xf32>, vector<192x256xf32>, vector<8x256xf32> -> vector<8x256xf32>
    %c0_3 = arith.constant 0 : index
    %c0_4 = arith.constant 0 : index
    %3 = vector.load %arg3[%c0_3, %c0_4] : memref<1x256xf32, #tpu.memory_space<vmem>>, vector<1x256xf32>
    %4 = vector.broadcast %3 : vector<1x256xf32> to vector<8x256xf32>
    %5 = arith.addf %2, %4 : vector<8x256xf32>
    %cst_5 = arith.constant 0.000000e+00 : f32
    %6 = vector.broadcast %cst_5 : f32 to vector<8x256xf32>
    %7 = arith.maximumf %5, %6 : vector<8x256xf32>
    %8 = vector.extract_strided_slice %7 {offsets = [0, 0], sizes = [8, 128], strides = [1, 1]} : vector<8x256xf32> to vector<8x128xf32>
    %9 = vector.extract_strided_slice %7 {offsets = [0, 128], sizes = [8, 128], strides = [1, 1]} : vector<8x256xf32> to vector<8x128xf32>
    %10 = arith.maximumf %8, %9 : vector<8x128xf32>
    %11 = vector.extract_strided_slice %10 {offsets = [0, 0], sizes = [8, 64], strides = [1, 1]} : vector<8x128xf32> to vector<8x64xf32>
    %12 = vector.extract_strided_slice %10 {offsets = [0, 64], sizes = [8, 64], strides = [1, 1]} : vector<8x128xf32> to vector<8x64xf32>
    %13 = arith.maximumf %11, %12 : vector<8x64xf32>
    %c0_6 = arith.constant 0 : index
    %c0_7 = arith.constant 0 : index
    %14 = vector.load %arg4[%c0_6, %c0_7] : memref<64x18xf32, #tpu.memory_space<vmem>>, vector<64x18xf32>
    %cst_8 = arith.constant dense<0.000000e+00> : vector<8x18xf32>
    %15 = tpu.matmul %13, %14, %cst_8 {dimension_numbers = #tpu.dot_dimension_numbers<[1], [0], [0], [1], [0, 0, 1, 1], [], []>} : vector<8x64xf32>, vector<64x18xf32>, vector<8x18xf32> -> vector<8x18xf32>
    %c0_9 = arith.constant 0 : index
    %c0_10 = arith.constant 0 : index
    %16 = vector.load %arg5[%c0_9, %c0_10] : memref<1x18xf32, #tpu.memory_space<vmem>>, vector<1x18xf32>
    %17 = vector.broadcast %16 : vector<1x18xf32> to vector<8x18xf32>
    %18 = arith.addf %15, %17 : vector<8x18xf32>
    %cst_11 = arith.constant 0.000000e+00 : f32
    %19 = vector.broadcast %cst_11 : f32 to vector<8x18xf32>
    %20 = arith.maximumf %18, %19 : vector<8x18xf32>
    %c0_12 = arith.constant 0 : index
    %c0_13 = arith.constant 0 : index
    %21 = vector.load %arg6[%c0_12, %c0_13] : memref<18x4xf32, #tpu.memory_space<vmem>>, vector<18x4xf32>
    %cst_14 = arith.constant dense<0.000000e+00> : vector<8x4xf32>
    %22 = tpu.matmul %20, %21, %cst_14 {dimension_numbers = #tpu.dot_dimension_numbers<[1], [0], [0], [1], [0, 0, 1, 1], [], []>} : vector<8x18xf32>, vector<18x4xf32>, vector<8x4xf32> -> vector<8x4xf32>
    %c0_15 = arith.constant 0 : index
    %c0_16 = arith.constant 0 : index
    %23 = vector.load %arg7[%c0_15, %c0_16] : memref<1x4xf32, #tpu.memory_space<vmem>>, vector<1x4xf32>
    %24 = vector.broadcast %23 : vector<1x4xf32> to vector<8x4xf32>
    %25 = arith.addf %22, %24 : vector<8x4xf32>
    %c0_17 = arith.constant 0 : index
    %c0_18 = arith.constant 0 : index
    %26 = vector.load %arg8[%c0_17, %c0_18] : memref<8x4xf32, #tpu.memory_space<vmem>>, vector<8x4xf32>
    tpu.vector_store %arg8[%c0_17, %c0_18], %25 {strides = array<i32>} : memref<8x4xf32, #tpu.memory_space<vmem>>, vector<8x4xf32>,
    return
  }
  func.func @transform_0(%arg0: i32) -> (i32, i32) {
    %c0_i32 = arith.constant 0 : i32
    %c0_i32_0 = arith.constant 0 : i32
    return %arg0, %c0_i32 : i32, i32
  }
  func.func @transform_1(%arg0: i32) -> (i32, i32) {
    %c0_i32 = arith.constant 0 : i32
    %c0_i32_0 = arith.constant 0 : i32
    %c0_i32_1 = arith.constant 0 : i32
    return %c0_i32, %c0_i32_0 : i32, i32
  }
  func.func @transform_2(%arg0: i32) -> (i32, i32) {
    %c0_i32 = arith.constant 0 : i32
    %c0_i32_0 = arith.constant 0 : i32
    %c0_i32_1 = arith.constant 0 : i32
    return %c0_i32, %c0_i32_0 : i32, i32
  }
  func.func @transform_3(%arg0: i32) -> (i32, i32) {
    %c0_i32 = arith.constant 0 : i32
    %c0_i32_0 = arith.constant 0 : i32
    %c0_i32_1 = arith.constant 0 : i32
    return %c0_i32, %c0_i32_0 : i32, i32
  }
  func.func @transform_4(%arg0: i32) -> (i32, i32) {
    %c0_i32 = arith.constant 0 : i32
    %c0_i32_0 = arith.constant 0 : i32
    %c0_i32_1 = arith.constant 0 : i32
    return %c0_i32, %c0_i32_0 : i32, i32
  }
  func.func @transform_5(%arg0: i32) -> (i32, i32) {
    %c0_i32 = arith.constant 0 : i32
    %c0_i32_0 = arith.constant 0 : i32
    %c0_i32_1 = arith.constant 0 : i32
    return %c0_i32, %c0_i32_0 : i32, i32
  }
  func.func @transform_6(%arg0: i32) -> (i32, i32) {
    %c0_i32 = arith.constant 0 : i32
    %c0_i32_0 = arith.constant 0 : i32
    %c0_i32_1 = arith.constant 0 : i32
    return %c0_i32, %c0_i32_0 : i32, i32
  }
  func.func @transform_7(%arg0: i32) -> (i32, i32) {
    %c0_i32 = arith.constant 0 : i32
    %c0_i32_0 = arith.constant 0 : i32
    return %arg0, %c0_i32 : i32, i32
  }
}

</mosaic_0001>

<bundles_post_ra>
// kernel: tile.13
= control target key start
LH: loop header
LB: loop body
LE: loop exit
PB: predicated region body
PF: predicated region fallthrough
CT: control target
= control target key end

     0   :  { %s28_s0 = inlined_call_operand.vmem [shape: f32[6], index: 0, kind: input, shape index: {}]   ;;  %s29_s1 = inlined_call_operand.vmem [shape: f32[9,6], index: 1, kind: output, shape index: {}]  }
   0x1   :  { %v4_v0 = vld [vmem:[%s28_s0] ss:$0 sm:$0xff] }
   0x2   :  { %5 = vst [vmem:[%s29_s1] sm:$0xff] %v4_v0  ;;  %8 = vst [vmem:[%s29_s1 + $0x8] sm:$0xff] %v4_v0 }

// kernel: tile.14
= control target key start
LH: loop header
LB: loop body
LE: loop exit
PB: predicated region body
PF: predicated region fallthrough
CT: control target
= control target key end

     0   :  { %s77_s10 = smov 48   ;;  %s78_s11 = smov 36   ;;  %vm3_vm0 = vcmask 48128   ;;  %vm9_vm1 = vcmask 441728   ;;  %vm15_vm2 = vcmask 392528   ;;  %vm21_vm3 = vcmask 343328   ;;  %s125_s0 = inlined_call_operand.vmem [shape: f32[9,6], index: 0, kind: input, shape index: {}]   ;;  %s126_s1 = inlined_call_operand.vmem [shape: f32[54], index: 1, kind: output, shape index: {}]  }
   0x1   :  { %v61_v0 = vld [vmem:[%s125_s0 + $0x8] sm:$0x1]   ;;  %v63_v1 = vld [vmem:[%s125_s0 + $0x6] sm:$0x1]   ;;  %v62_v2 = vld [vmem:[%s125_s0 + $0x7] sm:$0x1]  }
   0x2   :  { %7 = vrot.lane.b32.xlu0 %v61_v0, %s77_s10  ;;  %19 = vrot.lane.b32.xlu1 %v63_v1, %s78_s11  ;;  %v64_v3 = vld [vmem:[%s125_s0 + $0x5] sm:$0x1]   ;;  %v2_v4 = vld [vmem:[%s125_s0] sm:$0x1]   ;;  %s79_s18 = smov 42   ;;  %s80_s19 = smov 30  }
   0x3   :  { %4 = vst.msk [vmem:[#allocation0] sm:$0x1] %vm3_vm0, %v2_v4   ;;  %v65_v5 = vld [vmem:[%s125_s0 + $0x4] sm:$0x1]   ;;  %v66_v6 = vld [vmem:[%s125_s0 + $0x3] sm:$0x1]  }
   0x4   :  { %s81_s24 = smov 24   ;;  %s82_s25 = smov 18   ;;  %v67_v7 = vld [vmem:[%s125_s0 + $0x2] sm:$0x1]   ;;  %v68_v8 = vld [vmem:[%s125_s0 + $0x1] sm:$0x1]  }
   0x5   :  { %s83_s0 = smov 12   ;;  %s84_s30 = smov 6   ;;  %vm27_vm4 = vcmask 294128   ;;  %vm33_vm5 = vcmask 244928   ;;  %vm39_vm6 = vcmask 195728   ;;  %vm45_vm7 = vcmask 146528  }
   0x6   :  { %13 = vrot.lane.b32.xlu0 %v62_v2, %s79_s18  ;;  %25 = vrot.lane.b32.xlu1 %v64_v3, %s80_s19  ;;  %vm51_vm8 = vcmask 97328  }
   0xa   :  { %31 = vrot.lane.b32.xlu0 %v65_v5, %s81_s24  ;;  %37 = vrot.lane.b32.xlu1 %v66_v6, %s82_s25 }
   0xe   :  { %43 = vrot.lane.b32.xlu0 %v67_v7, %s83_s0  ;;  %49 = vrot.lane.b32.xlu1 %v68_v8, %s84_s30 }
  0x74   :  { %v8_v9 = vpop.permute.xlu0 %7   ;;  %v20_v10 = vpop.permute.xlu1 %19  }
  0x75   :  { %10 = vst.msk [vmem:[#allocation0] sm:$0x1] %vm9_vm1, %v8_v9  }
  0x78   :  { %v14_v11 = vpop.permute.xlu0 %13   ;;  %v26_v12 = vpop.permute.xlu1 %25  }
  0x79   :  { %16 = vst.msk [vmem:[#allocation0] sm:$0x1] %vm15_vm2, %v14_v11  }
  0x7a   :  { %22 = vst.msk [vmem:[#allocation0] sm:$0x1] %vm21_vm3, %v20_v10  }
  0x7b   :  { %28 = vst.msk [vmem:[#allocation0] sm:$0x1] %vm27_vm4, %v26_v12  }
  0x7c   :  { %v32_v13 = vpop.permute.xlu0 %31   ;;  %v38_v14 = vpop.permute.xlu1 %37  }
  0x7d   :  { %34 = vst.msk [vmem:[#allocation0] sm:$0x1] %vm33_vm5, %v32_v13  }
  0x7e   :  { %40 = vst.msk [vmem:[#allocation0] sm:$0x1] %vm39_vm6, %v38_v14  }
  0x80   :  { %v44_v15 = vpop.permute.xlu0 %43   ;;  %v50_v16 = vpop.permute.xlu1 %49  }
  0x81   :  { %46 = vst.msk [vmem:[#allocation0] sm:$0x1] %vm45_vm7, %v44_v15  }
  0x82   :  { %52 = vst.msk [vmem:[#allocation0] sm:$0x1] %vm51_vm8, %v50_v16  }
  0x89   :  { %v57_v17 = vld [vmem:[#allocation0] sm:$0x1] }
  0x8a   :  { %60 = vst [vmem:[%s126_s1] sm:$0x1] %v57_v17 }

// kernel: tile.18
= control target key start
LH: loop header
LB: loop body
LE: loop exit
PB: predicated region body
PF: predicated region fallthrough
CT: control target
= control target key end

     0   :  { %s22_s0 = inlined_call_operand.vmem [shape: f32[64], index: 0, kind: input, shape index: {}]   ;;  %s23_s1 = inlined_call_operand.vmem [shape: f32[4,64], index: 1, kind: output, shape index: {}]  }
   0x1   :  { %v4_v0 = vld [vmem:[%s22_s0] ss:$0 sm:$0xff] }
   0x2   :  { %5 = vst [vmem:[%s23_s1] sm:$0xf] %v4_v0 }

// kernel: tile.19
= control target key start
LH: loop header
LB: loop body
LE: loop exit
PB: predicated region body
PF: predicated region fallthrough
CT: control target
= control target key end

     0   :  { %s7_s8 = smov 3  ;;  %vm9_vm0 = vcmask 523264   ;;  %s34_s9 = smov 64   ;;  %vm16_vm1 = vcmask 1048064   ;;  %s54_s0 = inlined_call_operand.vmem [shape: f32[4,64], index: 0, kind: input, shape index: {}]   ;;  %s55_s1 = inlined_call_operand.vmem [shape: f32[1,256], index: 1, kind: output, shape index: {}]  }
   0x1   :  { %v5_v0 = vld [vmem:[%s54_s0] sm:$0xf]  ;;  %s12_s0 = smov 3 }
   0x2   :  { %6 = vst [vmem:[#allocation1] sm:$0xf] %v5_v0 }
   0x9   :  { %v13_v1 = vld [vmem:[#allocation1 + $0x1] ss:$2 sm:%s12_s0]   ;;  %v8_v2 = vld [vmem:[#allocation1] ss:$2 sm:%s7_s8]  }
   0xa   :  { %14 = vrot.lane.b32.xlu0 %v13_v1, %s34_s9  ;;  %10 = vst.msk [vmem:[#allocation0] ss:$8 sm:$0x3] %vm9_vm0, %v8_v2  }
  0x7c   :  { %v15_v3 = vpop.permute.xlu0 %14  }
  0x7d   :  { %17 = vst.msk [vmem:[#allocation0] ss:$8 sm:$0x3] %vm16_vm1, %v15_v3  }
  0x84   :  { %v22_v4 = vld [vmem:[#allocation0] sm:$0x1]  ;;  %v27_v5 = vld [vmem:[#allocation0 + $0x8] sm:$0x1] }
  0x85   :  { %25 = vst [vmem:[%s55_s1] sm:$0x1] %v22_v4  ;;  %32 = vst [vmem:[%s55_s1 + $0x1] sm:$0x1] %v27_v5 }

// kernel: convnet2d_forward.1
= control target key start
LH: loop header
LB: loop body
LE: loop exit
PB: predicated region body
PF: predicated region fallthrough
CT: control target
= control target key end

     0   :  { %vm88_vm0 = vcmask 523264   ;;  %v404_v50 = vmov 0.0   ;;  %v78_v57 = vlaneseq  ;;  %vm405_vm1 = vmmov 0   ;;  %s646_s1 = inlined_call_operand.vmem [shape: f32[192,256], index: 1, kind: input, shape index: {}]   ;;  %s647_s0 = inlined_call_operand.vmem [shape: f32[8,192], index: 0, kind: input, shape index: {}]   ;;  %s648_s3 = inlined_call_operand.vmem [shape: f32[64,18], index: 3, kind: input, shape index: {}]   ;;  %s649_s2 = inlined_call_operand.vmem [shape: f32[1,256], index: 2, kind: input, shape index: {}]   ;;  %s650_s5 = inlined_call_operand.vmem [shape: f32[18,4], index: 5, kind: input, shape index: {}]   ;;  %s651_s4 = inlined_call_operand.vmem [shape: f32[1,18], index: 4, kind: input, shape index: {}]   ;;  %s652_s6 = inlined_call_operand.vmem [shape: f32[1,4], index: 6, kind: input, shape index: {}]   ;;  %s653_s7 = inlined_call_operand.vmem [shape: f32[8,4], index: 7, kind: output, shape index: {}]  }
   0x1   :  { %v59_v0 = vld [vmem:[%s646_s1 + $0xf8] sm:$0xff]  ;;  %v58_v1 = vld [vmem:[%s646_s1 + $0xf0] sm:$0xff]  ;;  %v57_v2 = vld [vmem:[%s646_s1 + $0xe8] sm:$0xff]  ;;  %373 = vmatprep.subr.mxu1 %v404_v50  ;;  %389 = vmatprep.mubr.msk.f32.mxu1 %vm405_vm1, %v404_v50  ;;  %vm274_vm2 = vcmask 1041408   ;;  %vm270_vm3 = vcmask 146432   ;;  %vm348_vm4 = vcmask 31744  }
   0x2   :  { %92 = vmatprep.subr.mxu0 %v59_v0  ;;  %v56_v3 = vld [vmem:[%s646_s1 + $0xe0] sm:$0xff]  ;;  %v55_v4 = vld [vmem:[%s646_s1 + $0xd8] sm:$0xff]  ;;  %v54_v5 = vld [vmem:[%s646_s1 + $0xd0] sm:$0xff]  ;;  %v79_v58 = vshrl.u32 %v78_v57, 7 }
   0x3   :  { %93 = vmatpush1.msra.mxu0 %v58_v1  ;;  %v53_v6 = vld [vmem:[%s646_s1 + $0xc8] sm:$0xff]  ;;  %v52_v7 = vld [vmem:[%s646_s1 + $0xc0] sm:$0xff]  ;;  %v51_v8 = vld [vmem:[%s646_s1 + $0xb8] sm:$0xff] }
   0x4   :  { %94 = vmatprep.subr.mxu0 %v57_v2  ;;  %v50_v9 = vld [vmem:[%s646_s1 + $0xb0] sm:$0xff]  ;;  %v49_v10 = vld [vmem:[%s646_s1 + $0xa8] sm:$0xff]  ;;  %v48_v11 = vld [vmem:[%s646_s1 + $0xa0] sm:$0xff]  ;;  %v80_v59 = vsub.s32 0, %v79_v58  ;;  %v84_v62 = vsub.s32 1, %v79_v58 }
   0x5   :  { %95 = vmatpush1.msra.mxu0 %v56_v3  ;;  %v47_v12 = vld [vmem:[%s646_s1 + $0x98] sm:$0xff]  ;;  %v46_v13 = vld [vmem:[%s646_s1 + $0x90] sm:$0xff]  ;;  %v45_v14 = vld [vmem:[%s646_s1 + $0x88] sm:$0xff] }
   0x6   :  { %96 = vmatprep.subr.mxu0 %v55_v4  ;;  %v44_v15 = vld [vmem:[%s646_s1 + $0x80] sm:$0xff]  ;;  %v43_v16 = vld [vmem:[%s646_s1 + $0x78] sm:$0xff]  ;;  %v42_v17 = vld [vmem:[%s646_s1 + $0x70] sm:$0xff] }
   0x7   :  { %97 = vmatpush1.msra.mxu0 %v54_v5  ;;  %v41_v18 = vld [vmem:[%s646_s1 + $0x68] sm:$0xff]  ;;  %v40_v20 = vld [vmem:[%s646_s1 + $0x60] sm:$0xff]  ;;  %v39_v21 = vld [vmem:[%s646_s1 + $0x58] sm:$0xff] }
   0x8   :  { %98 = vmatprep.subr.mxu0 %v53_v6  ;;  %v27_v19 = vld [vmem:[%s647_s0 + $0x8] sm:$0xff]  ;;  %v38_v22 = vld [vmem:[%s646_s1 + $0x50] sm:$0xff]  ;;  %v36_v24 = vld [vmem:[%s646_s1 + $0x40] sm:$0xff] }
   0x9   :  { %99 = vmatpush1.msra.mxu0 %v52_v7  ;;  %354 = vmatprep.mubr.msk.f32.mxu0 %vm88_vm0, %v27_v19  ;;  %v37_v23 = vld [vmem:[%s646_s1 + $0x48] sm:$0xff]  ;;  %v35_v25 = vld [vmem:[%s646_s1 + $0x38] sm:$0xff]  ;;  %v34_v26 = vld [vmem:[%s646_s1 + $0x30] sm:$0xff] }
   0xa   :  { %100 = vmatprep.subr.mxu0 %v51_v8  ;;  %v33_v27 = vld [vmem:[%s646_s1 + $0x28] sm:$0xff]  ;;  %v32_v28 = vld [vmem:[%s646_s1 + $0x20] sm:$0xff]  ;;  %v31_v29 = vld [vmem:[%s646_s1 + $0x18] sm:$0xff] }
   0xb   :  { %101 = vmatpush1.msra.mxu0 %v50_v9  ;;  %v30_v30 = vld [vmem:[%s646_s1 + $0x10] sm:$0xff]  ;;  %v29_v31 = vld [vmem:[%s646_s1 + $0x8] sm:$0xff]  ;;  %v28_v32 = vld [vmem:[%s646_s1] sm:$0xff] }
   0xc   :  { %102 = vmatprep.subr.mxu0 %v49_v10  ;;  %v75_v33 = vld [vmem:[%s646_s1 + $0x178] sm:$0xff]  ;;  %v74_v34 = vld [vmem:[%s646_s1 + $0x170] sm:$0xff]  ;;  %v73_v35 = vld [vmem:[%s646_s1 + $0x168] sm:$0xff] }
   0xd   :  { %103 = vmatpush1.msra.mxu0 %v48_v11  ;;  %v72_v36 = vld [vmem:[%s646_s1 + $0x160] sm:$0xff]  ;;  %v71_v37 = vld [vmem:[%s646_s1 + $0x158] sm:$0xff]  ;;  %v70_v38 = vld [vmem:[%s646_s1 + $0x150] sm:$0xff] }
   0xe   :  { %104 = vmatprep.subr.mxu0 %v47_v12  ;;  %v69_v39 = vld [vmem:[%s646_s1 + $0x148] sm:$0xff]  ;;  %v68_v40 = vld [vmem:[%s646_s1 + $0x140] sm:$0xff]  ;;  %v67_v41 = vld [vmem:[%s646_s1 + $0x138] sm:$0xff] }
   0xf   :  { %105 = vmatpush1.msra.mxu0 %v46_v13  ;;  %v66_v42 = vld [vmem:[%s646_s1 + $0x130] sm:$0xff]  ;;  %v65_v43 = vld [vmem:[%s646_s1 + $0x128] sm:$0xff]  ;;  %v64_v44 = vld [vmem:[%s646_s1 + $0x120] sm:$0xff] }
  0x10   :  { %106 = vmatprep.subr.mxu0 %v45_v14  ;;  %v63_v45 = vld [vmem:[%s646_s1 + $0x118] sm:$0xff]  ;;  %v62_v46 = vld [vmem:[%s646_s1 + $0x110] sm:$0xff]  ;;  %v61_v47 = vld [vmem:[%s646_s1 + $0x108] sm:$0xff] }
  0x11   :  { %107 = vmatpush1.msra.mxu0 %v44_v15  ;;  %v60_v48 = vld [vmem:[%s646_s1 + $0x100] sm:$0xff]  ;;  %v178_v51 = vld [vmem:[%s648_s3 + $0x38] sm:$0xff]  ;;  %v177_v52 = vld [vmem:[%s648_s3 + $0x30] sm:$0xff] }
  0x12   :  { %108 = vmatprep.subr.mxu0 %v43_v16  ;;  %v26_v49 = vld [vmem:[%s647_s0] sm:$0xff]  ;;  %374 = vmatpush3.msra.mxu1 %v178_v51  ;;  %v176_v53 = vld [vmem:[%s648_s3 + $0x28] sm:$0xff]  ;;  %v174_v55 = vld [vmem:[%s648_s3 + $0x18] sm:$0xff] }
  0x13   :  { %109 = vmatpush1.msra.mxu0 %v42_v17  ;;  %375 = vmatprep.subr.mxu1 %v404_v50  ;;  %v175_v54 = vld [vmem:[%s648_s3 + $0x20] sm:$0xff]  ;;  %v173_v56 = vld [vmem:[%s648_s3 + $0x10] sm:$0xff]  ;;  %v172_v61 = vld [vmem:[%s648_s3 + $0x8] sm:$0xff] }
  0x14   :  { %110 = vmatprep.subr.mxu0 %v41_v18  ;;  %376 = vmatpush3.msra.mxu1 %v177_v52  ;;  %v76_v60 = vld [vmem:[%s649_s2] sm:$0x3]  ;;  %s406_s2 = smov 64   ;;  %v262_v11 = vld [vmem:[%s650_s5 + $0x10] sm:$0x3]  ;;  %v261_v12 = vld [vmem:[%s650_s5 + $0x8] sm:$0xff] }
  0x15   :  { %111 = vmatpush1.msra.mxu0 %v40_v20  ;;  %377 = vmatprep.subr.mxu1 %v404_v50  ;;  %v171_v63 = vld [vmem:[%s648_s3] sm:$0xff]  ;;  %v81_v0 = vrot.slane %v76_v60, %v80_v59  ;;  %v85_v1 = vrot.slane %v76_v60, %v84_v62 }
  0x16   :  { %112 = vmatprep.subr.mxu0 %v39_v21  ;;  %378 = vmatpush3.msra.mxu1 %v176_v53  ;;  %v260_v13 = vld [vmem:[%s650_s5] sm:$0xff] }
  0x17   :  { %113 = vmatpush1.msra.mxu0 %v38_v22  ;;  %379 = vmatprep.subr.mxu1 %v404_v50  ;;  %v355_v14 = vld [vmem:[%s651_s4] ss:$0 sm:$0xff] }
  0x18   :  { %114 = vmatprep.subr.mxu0 %v37_v23  ;;  %380 = vmatpush3.msra.mxu1 %v175_v54  ;;  %v357_v19 = vld [vmem:[%s652_s6] ss:$0 sm:$0xff] }
  0x19   :  { %115 = vmatpush1.msra.mxu0 %v36_v24  ;;  %381 = vmatprep.subr.mxu1 %v404_v50 }
  0x1a   :  { %116 = vmatprep.subr.mxu0 %v35_v25  ;;  %382 = vmatpush3.msra.mxu1 %v174_v55 }
  0x1b   :  { %117 = vmatpush1.msra.mxu0 %v34_v26  ;;  %383 = vmatprep.subr.mxu1 %v404_v50 }
  0x1c   :  { %118 = vmatprep.subr.mxu0 %v33_v27  ;;  %384 = vmatpush3.msra.mxu1 %v173_v56 }
  0x1d   :  { %119 = vmatpush1.msra.mxu0 %v32_v28  ;;  %385 = vmatprep.subr.mxu1 %v404_v50 }
  0x1e   :  { %120 = vmatprep.subr.mxu0 %v31_v29  ;;  %386 = vmatpush3.msra.mxu1 %v172_v61 }
  0x1f   :  { %121 = vmatpush1.msra.mxu0 %v30_v30  ;;  %387 = vmatprep.subr.mxu1 %v404_v50 }
  0x20   :  { %122 = vmatprep.subr.mxu0 %v29_v31  ;;  %388 = vmatpush3.msra.mxu1 %v171_v63 }
  0x21   :  { %123 = vmatpush1.msra.mxu0 %v28_v32  ;;  %392 = vmatprep.subr.mxu1 %v404_v50 }
  0x22   :  { %140 = vmatprep.subr.mxu0 %v75_v33 }
  0x23   :  { %141 = vmatpush2.msra.mxu0 %v74_v34 }
  0x24   :  { %142 = vmatprep.subr.mxu0 %v73_v35 }
  0x25   :  { %143 = vmatpush2.msra.mxu0 %v72_v36 }
  0x26   :  { %144 = vmatprep.subr.mxu0 %v71_v37 }
  0x27   :  { %145 = vmatpush2.msra.mxu0 %v70_v38 }
  0x28   :  { %146 = vmatprep.subr.mxu0 %v69_v39 }
  0x29   :  { %147 = vmatpush2.msra.mxu0 %v68_v40 }
  0x2a   :  { %148 = vmatprep.subr.mxu0 %v67_v41 }
  0x2b   :  { %149 = vmatpush2.msra.mxu0 %v66_v42 }
  0x2c   :  { %150 = vmatprep.subr.mxu0 %v65_v43 }
  0x2d   :  { %151 = vmatpush2.msra.mxu0 %v64_v44 }
  0x2e   :  { %152 = vmatprep.subr.mxu0 %v63_v45 }
  0x2f   :  { %153 = vmatpush2.msra.mxu0 %v62_v46 }
  0x30   :  { %154 = vmatprep.subr.mxu0 %v61_v47 }
  0x31   :  { %155 = vmatpush2.msra.mxu0 %v60_v48 }
  0x32   :  { %157 = vmatmul.mubr.f32.vlgmr.msra.gmra.mxu0 %v26_v49 }
  0xf2   :  { %v158_v2 = vpop.f32.mrf.mxu0 }
  0xf3   :  { %v159_v3 = vadd.f32 %v158_v2, %v81_v0 }
  0xf4   :  { %v160_v4 = vpop.f32.mrf.mxu0 }
  0xf5   :  { %v161_v5 = vadd.f32 %v160_v4, %v85_v1  ;;  %v163_v6 = vmax.f32 %v159_v3, 0.0 }
  0xf7   :  { %v164_v7 = vmax.f32 %v161_v5, 0.0 }
  0xf9   :  { %v165_v8 = vmax.f32 %v163_v6, %v164_v7 }
  0xfb   :  { %167 = vrot.lane.b32.xlu0 %v165_v8, %s406_s2 }
 0x16d   :  { %v168_v9 = vpop.permute.xlu0 %167 }
 0x16e   :  { %v170_v10 = vmax.f32 %v165_v8, %v168_v9 }
 0x170   :  { %390 = vmatmul.mubr.msk.f32.vlgmr.msra.gmra.mxu1 %vm88_vm0, %v170_v10 }
 0x171   :  { %398 = vmatprep.mubr.msk.f32.mxu1 %vm405_vm1, %v404_v50  ;;  %393 = vmatpush3.msk.msra.mxu1 %vm274_vm2, %v262_v11 }
 0x172   :  { %394 = vmatprep.subr.mxu1 %v404_v50 }
 0x173   :  { %395 = vmatpush3.msra.mxu1 %v261_v12 }
 0x174   :  { %396 = vmatprep.subr.mxu1 %v404_v50 }
 0x175   :  { %397 = vmatpush3.msra.mxu1 %v260_v13 }
 0x230   :  { %v255_v15 = vpop.f32.mrf.mxu1 }
 0x231   :  { %v256_v16 = vadd.f32 %v355_v14, %v255_v15 }
 0x232   :  { %v391_v17 = vpop.f32.mrf.mxu1 }
 0x233   :  { %v259_v18 = vmax.f32 %v256_v16, 0.0 }
 0x235   :  { %399 = vmatmul.mubr.msk.f32.vlgmr.msra.gmra.mxu1 %vm270_vm3, %v259_v18 }
 0x2f5   :  { %v344_v20 = vpop.f32.mrf.mxu1 }
 0x2f6   :  { %v345_v21 = vadd.f32 %v357_v19, %v344_v20 }
 0x2f7   :  { %v400_v22 = vpop.f32.mrf.mxu1 }
 0x2f8   :  { %349 = vst.msk [vmem:[%s653_s7] sm:$0xff] %vm348_vm4, %v345_v21 }

</bundles_post_ra>
